<compile_context>
chip_gen: v6e
topology: v6e:2x2x1
jax: 0.10.0
libtpu: 0.0.40
codegen_flags: <defaults>
</compile_context>

<pallas_src>
import math
import jax
import jax.numpy as jnp
from jax import lax
from jax.experimental import pallas as pl
from jax.experimental.pallas import tpu as pltpu

D_K = 1                          # module hyperparameter
_SCALE = 1.0 / math.sqrt(D_K)    # == 1.0 -> scaling is a no-op, omitted in-kernel
LANE = 128


def _mha_kernel(qkv_ref, m_ref, o_ref):
    # qkv_ref: (Bq, Lq + 2*Lk, E_pad)  -- Q rows, then K rows, then V rows
    # m_ref:   (Bm, Lq, Lk)
    # o_ref:   (Bm*Bq*Lq, E_pad)       -- lane-dense output slab, one store
    Bm, Lq, Lk = m_ref.shape
    Bq = qkv_ref.shape[0]

    # Per-query-batch work hoisted out of the mask loop (QK^T depends only on j).
    scores = []
    values = []
    for j in range(Bq):                              # static, unrolled (Bq == 2)
        q = qkv_ref[j, 0:Lq, :]                      # (Lq, E_pad)
        k = qkv_ref[j, Lq:Lq + Lk, :]                # (Lk, E_pad)
        values.append(qkv_ref[j, Lq + Lk:Lq + 2 * Lk, :])   # (Lk, E_pad)
        # Contract the (zero-padded) E axis directly — padding adds exact zeros.
        s = lax.dot_general(q, k,
                            dimension_numbers=(((1,), (1,)), ((), ())),
                            preferred_element_type=jnp.float32)      # (Lq, Lk)
        if _SCALE != 1.0:                            # d_k == 1 -> folded at trace time
            s = s * _SCALE
        scores.append(s)

    # Output row order is (mask-batch, query-batch, query) -> m-major collection.
    outs = []
    for i in range(Bm):                              # static, unrolled (Bm == 2)
        m_i = m_ref[i]                               # (Lq, Lk) broadcast mask
        for j in range(Bq):
            sm = scores[j] + m_i
            sm_max = jnp.max(sm, axis=-1, keepdims=True)
            p = jnp.exp(sm - sm_max)
            denom = jnp.sum(p, axis=-1, keepdims=True)
            p = p / denom                            # exact divide (no approx recip)
            outs.append(jnp.dot(p, values[j],
                                preferred_element_type=jnp.float32))  # (Lq, E_pad)

    # Single contiguous, unmasked store of the whole (Bm*Bq*Lq, 128) slab.
    o_ref[...] = jnp.concatenate(outs, axis=0).astype(o_ref.dtype)


@jax.jit
def multi_head_attention(query, key, value, attn_mask):
    Bq, Lq, E = query.shape
    _, Lk, _ = key.shape
    Bm = attn_mask.shape[0]
    E_pad = ((E + LANE - 1) // LANE) * LANE

    def pad_e(x):
        return jnp.pad(x, ((0, 0), (0, 0), (0, E_pad - E)))

    # Pack Q/K/V into one lane-dense VMEM input (1 DMA instead of 3).
    qkv = jnp.concatenate([pad_e(query), pad_e(key), pad_e(value)], axis=1)
    mask = attn_mask.reshape(Bm, Lq, Lk)

    vmem = pl.BlockSpec(memory_space=pltpu.MemorySpace.VMEM)
    slab = pl.pallas_call(
        _mha_kernel,
        out_shape=jax.ShapeDtypeStruct((Bm * Bq * Lq, E_pad), query.dtype),
        in_specs=[vmem, vmem],     # whole (few-KiB) problem resident in VMEM
        out_specs=vmem,            # single invocation, no grid
    )(qkv, mask)

    # Slice the zero padding back off outside the kernel.
    return slab.reshape(Bm, Bq, Lq, E_pad)[..., :E]


def _reference(query, key, value, attn_mask):
    # Plain-JAX reference matching the PyTorch module's semantics exactly.
    qk = jnp.einsum("bqe,bke->bqk", query, key) / math.sqrt(D_K)    # (Bq,Lq,Lk)
    qk = qk[None, :, :, :] + attn_mask                              # (Bm,Bq,Lq,Lk)
    w = jax.nn.softmax(qk, axis=-1)
    return jnp.einsum("mbqk,bke->mbqe", w, value)                   # (Bm,Bq,Lq,E)


if __name__ == "__main__":
    k0 = jax.random.PRNGKey(0)
    k1, k2, k3, k4 = jax.random.split(k0, 4)

    # shapes taken from the module's globals
    query = jax.random.normal(k1, (2, 4, 9), dtype=jnp.float32)
    key = jax.random.normal(k2, (2, 10, 9), dtype=jnp.float32)
    value = jax.random.normal(k3, (2, 10, 9), dtype=jnp.float32)
    attn_mask = jax.random.normal(k4, (2, 1, 4, 10), dtype=jnp.float32)

    out = jax.block_until_ready(multi_head_attention(query, key, value, attn_mask))

    ref = _reference(query, key, value, attn_mask)
    assert out.shape == (2, 2, 4, 9), out.shape
    # exact softmax normalization -> tight tolerance
    assert jnp.allclose(out, ref, atol=1e-5, rtol=1e-5), "mismatch vs reference"

    print("KERNEL_OK")
</pallas_src>

<mosaic_0001>
module attributes {stable_mosaic.version = 11 : i64} {
  func.func @_mha_kernel(%arg0: memref<2x24x128xf32, #tpu.memory_space<vmem>>, %arg1: memref<2x4x10xf32, #tpu.memory_space<vmem>>, %arg2: memref<16x128xf32, #tpu.memory_space<vmem>>) attributes {dimension_semantics = [], scalar_prefetch = 0 : i64, scratch_operands = 0 : i64, tpu.core_type = #tpu.core_type<tc>} {
    %c0 = arith.constant 0 : index
    %c0_0 = arith.constant 0 : index
    %c0_1 = arith.constant 0 : index
    %0 = vector.load %arg0[%c0, %c0_0, %c0_1] : memref<2x24x128xf32, #tpu.memory_space<vmem>>, vector<1x4x128xf32>
    %1 = vector.shape_cast %0 : vector<1x4x128xf32> to vector<4x128xf32>
    %c0_2 = arith.constant 0 : index
    %c4 = arith.constant 4 : index
    %c0_3 = arith.constant 0 : index
    %2 = vector.load %arg0[%c0_2, %c4, %c0_3] : memref<2x24x128xf32, #tpu.memory_space<vmem>>, vector<1x10x128xf32>
    %3 = vector.shape_cast %2 : vector<1x10x128xf32> to vector<10x128xf32>
    %c0_4 = arith.constant 0 : index
    %c14 = arith.constant 14 : index
    %c0_5 = arith.constant 0 : index
    %4 = vector.load %arg0[%c0_4, %c14, %c0_5] : memref<2x24x128xf32, #tpu.memory_space<vmem>>, vector<1x10x128xf32>
    %5 = vector.shape_cast %4 : vector<1x10x128xf32> to vector<10x128xf32>
    %cst = arith.constant dense<0.000000e+00> : vector<4x10xf32>
    %6 = tpu.matmul %1, %3, %cst {dimension_numbers = #tpu.dot_dimension_numbers<[1], [1], [0], [0], [0, 0, 1, 0], [], []>} : vector<4x128xf32>, vector<10x128xf32>, vector<4x10xf32> -> vector<4x10xf32>
    %c1 = arith.constant 1 : index
    %c0_6 = arith.constant 0 : index
    %c0_7 = arith.constant 0 : index
    %7 = vector.load %arg0[%c1, %c0_6, %c0_7] : memref<2x24x128xf32, #tpu.memory_space<vmem>>, vector<1x4x128xf32>
    %8 = vector.shape_cast %7 : vector<1x4x128xf32> to vector<4x128xf32>
    %c1_8 = arith.constant 1 : index
    %c4_9 = arith.constant 4 : index
    %c0_10 = arith.constant 0 : index
    %9 = vector.load %arg0[%c1_8, %c4_9, %c0_10] : memref<2x24x128xf32, #tpu.memory_space<vmem>>, vector<1x10x128xf32>
    %10 = vector.shape_cast %9 : vector<1x10x128xf32> to vector<10x128xf32>
    %c1_11 = arith.constant 1 : index
    %c14_12 = arith.constant 14 : index
    %c0_13 = arith.constant 0 : index
    %11 = vector.load %arg0[%c1_11, %c14_12, %c0_13] : memref<2x24x128xf32, #tpu.memory_space<vmem>>, vector<1x10x128xf32>
    %12 = vector.shape_cast %11 : vector<1x10x128xf32> to vector<10x128xf32>
    %cst_14 = arith.constant dense<0.000000e+00> : vector<4x10xf32>
    %13 = tpu.matmul %8, %10, %cst_14 {dimension_numbers = #tpu.dot_dimension_numbers<[1], [1], [0], [0], [0, 0, 1, 0], [], []>} : vector<4x128xf32>, vector<10x128xf32>, vector<4x10xf32> -> vector<4x10xf32>
    %c0_15 = arith.constant 0 : index
    %c0_16 = arith.constant 0 : index
    %c0_17 = arith.constant 0 : index
    %14 = vector.load %arg1[%c0_15, %c0_16, %c0_17] : memref<2x4x10xf32, #tpu.memory_space<vmem>>, vector<1x4x10xf32>
    %15 = vector.shape_cast %14 : vector<1x4x10xf32> to vector<4x10xf32>
    %16 = arith.addf %6, %15 : vector<4x10xf32>
    %cst_18 = arith.constant dense<0xFF800000> : vector<4xf32>
    %17 = vector.multi_reduction <maximumf>, %16, %cst_18 [1] : vector<4x10xf32> to vector<4xf32>
    %18 = vector.shape_cast %17 : vector<4xf32> to vector<4x1xf32>
    %19 = vector.broadcast %18 : vector<4x1xf32> to vector<4x10xf32>
    %20 = arith.subf %16, %19 : vector<4x10xf32>
    %21 = math.exp %20 : vector<4x10xf32>
    %cst_19 = arith.constant dense<0.000000e+00> : vector<4xf32>
    %22 = vector.multi_reduction <add>, %21, %cst_19 [1] : vector<4x10xf32> to vector<4xf32>
    %23 = vector.shape_cast %22 : vector<4xf32> to vector<4x1xf32>
    %24 = vector.broadcast %23 : vector<4x1xf32> to vector<4x10xf32>
    %25 = arith.divf %21, %24 : vector<4x10xf32>
    %cst_20 = arith.constant dense<0.000000e+00> : vector<4x128xf32>
    %26 = tpu.matmul %25, %5, %cst_20 {dimension_numbers = #tpu.dot_dimension_numbers<[1], [0], [0], [1], [0, 0, 1, 1], [], []>} : vector<4x10xf32>, vector<10x128xf32>, vector<4x128xf32> -> vector<4x128xf32>
    %27 = arith.addf %13, %15 : vector<4x10xf32>
    %cst_21 = arith.constant dense<0xFF800000> : vector<4xf32>
    %28 = vector.multi_reduction <maximumf>, %27, %cst_21 [1] : vector<4x10xf32> to vector<4xf32>
    %29 = vector.shape_cast %28 : vector<4xf32> to vector<4x1xf32>
    %30 = vector.broadcast %29 : vector<4x1xf32> to vector<4x10xf32>
    %31 = arith.subf %27, %30 : vector<4x10xf32>
    %32 = math.exp %31 : vector<4x10xf32>
    %cst_22 = arith.constant dense<0.000000e+00> : vector<4xf32>
    %33 = vector.multi_reduction <add>, %32, %cst_22 [1] : vector<4x10xf32> to vector<4xf32>
    %34 = vector.shape_cast %33 : vector<4xf32> to vector<4x1xf32>
    %35 = vector.broadcast %34 : vector<4x1xf32> to vector<4x10xf32>
    %36 = arith.divf %32, %35 : vector<4x10xf32>
    %cst_23 = arith.constant dense<0.000000e+00> : vector<4x128xf32>
    %37 = tpu.matmul %36, %12, %cst_23 {dimension_numbers = #tpu.dot_dimension_numbers<[1], [0], [0], [1], [0, 0, 1, 1], [], []>} : vector<4x10xf32>, vector<10x128xf32>, vector<4x128xf32> -> vector<4x128xf32>
    %c1_24 = arith.constant 1 : index
    %c0_25 = arith.constant 0 : index
    %c0_26 = arith.constant 0 : index
    %38 = vector.load %arg1[%c1_24, %c0_25, %c0_26] : memref<2x4x10xf32, #tpu.memory_space<vmem>>, vector<1x4x10xf32>
    %39 = vector.shape_cast %38 : vector<1x4x10xf32> to vector<4x10xf32>
    %40 = arith.addf %6, %39 : vector<4x10xf32>
    %cst_27 = arith.constant dense<0xFF800000> : vector<4xf32>
    %41 = vector.multi_reduction <maximumf>, %40, %cst_27 [1] : vector<4x10xf32> to vector<4xf32>
    %42 = vector.shape_cast %41 : vector<4xf32> to vector<4x1xf32>
    %43 = vector.broadcast %42 : vector<4x1xf32> to vector<4x10xf32>
    %44 = arith.subf %40, %43 : vector<4x10xf32>
    %45 = math.exp %44 : vector<4x10xf32>
    %cst_28 = arith.constant dense<0.000000e+00> : vector<4xf32>
    %46 = vector.multi_reduction <add>, %45, %cst_28 [1] : vector<4x10xf32> to vector<4xf32>
    %47 = vector.shape_cast %46 : vector<4xf32> to vector<4x1xf32>
    %48 = vector.broadcast %47 : vector<4x1xf32> to vector<4x10xf32>
    %49 = arith.divf %45, %48 : vector<4x10xf32>
    %cst_29 = arith.constant dense<0.000000e+00> : vector<4x128xf32>
    %50 = tpu.matmul %49, %5, %cst_29 {dimension_numbers = #tpu.dot_dimension_numbers<[1], [0], [0], [1], [0, 0, 1, 1], [], []>} : vector<4x10xf32>, vector<10x128xf32>, vector<4x128xf32> -> vector<4x128xf32>
    %51 = arith.addf %13, %39 : vector<4x10xf32>
    %cst_30 = arith.constant dense<0xFF800000> : vector<4xf32>
    %52 = vector.multi_reduction <maximumf>, %51, %cst_30 [1] : vector<4x10xf32> to vector<4xf32>
    %53 = vector.shape_cast %52 : vector<4xf32> to vector<4x1xf32>
    %54 = vector.broadcast %53 : vector<4x1xf32> to vector<4x10xf32>
    %55 = arith.subf %51, %54 : vector<4x10xf32>
    %56 = math.exp %55 : vector<4x10xf32>
    %cst_31 = arith.constant dense<0.000000e+00> : vector<4xf32>
    %57 = vector.multi_reduction <add>, %56, %cst_31 [1] : vector<4x10xf32> to vector<4xf32>
    %58 = vector.shape_cast %57 : vector<4xf32> to vector<4x1xf32>
    %59 = vector.broadcast %58 : vector<4x1xf32> to vector<4x10xf32>
    %60 = arith.divf %56, %59 : vector<4x10xf32>
    %cst_32 = arith.constant dense<0.000000e+00> : vector<4x128xf32>
    %61 = tpu.matmul %60, %12, %cst_32 {dimension_numbers = #tpu.dot_dimension_numbers<[1], [0], [0], [1], [0, 0, 1, 1], [], []>} : vector<4x10xf32>, vector<10x128xf32>, vector<4x128xf32> -> vector<4x128xf32>
    %62 = tpu.concatenate %26, %37, %50, %61 in 0 : vector<4x128xf32>, vector<4x128xf32>, vector<4x128xf32>, vector<4x128xf32> -> vector<16x128xf32>
    %c0_33 = arith.constant 0 : index
    %c0_34 = arith.constant 0 : index
    %63 = vector.load %arg2[%c0_33, %c0_34] : memref<16x128xf32, #tpu.memory_space<vmem>>, vector<16x128xf32>
    tpu.vector_store %arg2[%c0_33, %c0_34], %62 {strides = array<i32>} : memref<16x128xf32, #tpu.memory_space<vmem>>, vector<16x128xf32>,
    return
  }
}

</mosaic_0001>

<bundles_post_ra>
// kernel: multi_head_attention.1
= control target key start
LH: loop header
LB: loop body
LE: loop exit
PB: predicated region body
PF: predicated region fallthrough
CT: control target
= control target key end

     0   :  { %v659_v2 = vmov 0.0   ;;  %s758_s0 = inlined_call_operand.vmem [shape: f32[2,24,128], index: 0, kind: input, shape index: {}]   ;;  %s759_s1 = inlined_call_operand.vmem [shape: f32[2,4,10], index: 1, kind: input, shape index: {}]   ;;  %s760_s2 = inlined_call_operand.hbm [shape: f32[16,128], index: 2, kind: output, shape index: {}]  }
   0x1   :  { %v544_v0 = vld [vmem:[%s758_s0 + $0x24] sm:$0x3]  ;;  %v14_v1 = vld [vmem:[%s758_s0 + $0xc] sm:$0x3]  ;;  %581 = vmatprep.subr.mxu1 %v659_v2  ;;  %574 = vmatprep.subr.mxu0 %v659_v2 }
   0x2   :  { %582 = vmatpush3.xpose.msra.mxu1 %v544_v0  ;;  %575 = vmatpush3.xpose.msra.mxu0 %v14_v1 }
   0x3   :  { %7 = vsyncpa [#allocation3], 0  ;;  %583 = vmatprep.subr.mxu1 %v659_v2  ;;  %v543_v3 = vld [vmem:[%s758_s0 + $0x1c] sm:$0xff]  ;;  %576 = vmatprep.subr.mxu0 %v659_v2  ;;  %v13_v4 = vld [vmem:[%s758_s0 + $0x4] sm:$0xff]  ;;  %vm660_vm0 = vmmov 0   ;;  %vm165_vm1 = vcmask 76800  }
   0x4   :  { %585 = vmatprep.mubr.msk.f32.mxu1 %vm660_vm0, %v659_v2  ;;  %578 = vmatprep.mubr.msk.f32.mxu0 %vm660_vm0, %v659_v2  ;;  %v542_v5 = vld [vmem:[%s758_s0 + $0x18] sm:$0xf]  ;;  %v12_v6 = vld [vmem:[%s758_s0] sm:$0xf]  ;;  %v551_v8 = vld [vmem:[%s759_s1 + $0x4] sm:$0xf] }
   0x5   :  { %v163_v7 = vld [vmem:[%s759_s1] sm:$0xf]  ;;  %v546_v41 = vld [vmem:[%s758_s0 + $0x2e] sm:$0x3]  ;;  %vm181_vm2 = vcmask 1041408   ;;  %v545_v42 = vld [vmem:[%s758_s0 + $0x26] sm:$0xff] }
   0x6   :  { %584 = vmatpush3.xpose.msra.mxu1 %v543_v3  ;;  %577 = vmatpush3.xpose.msra.mxu0 %v13_v4  ;;  %v16_v43 = vld [vmem:[%s758_s0 + $0x16] sm:$0x3]  ;;  %v15_v44 = vld [vmem:[%s758_s0 + $0xe] sm:$0xff]  ;;  %vm177_vm3 = vcmask 80896   ;;  %vm521_vm4 = vcmask 1043456   ;;  %s661_s0 = smov [#allocation2]  }
   0x7   :  { %595 = vmatprep.subr.mxu1 %v659_v2  ;;  %588 = vmatprep.subr.mxu0 %v659_v2  ;;  %s531_s4 = sshll.u32 %s661_s0, 4  ;;  %s532_s4 = int_to_ptr.vmem [resolvable:$true] %s531_s4 }
   0x8   :  { %s637_s5 = scalar_lea.vmem %s532_s4, 256  ;;  %p642_p1 = scmp.lt.s32.totalorder %s532_s4, %s532_s4 }
   0x9   :  { %586 = vmatmul.mubr.f32.vlgmr.msra.gmra.mxu1 %v542_v5  ;;  %579 = vmatmul.mubr.f32.vlgmr.msra.gmra.mxu0 %v12_v6  ;;  %p638_p0 = scmp.ne.s32.totalorder %s532_s4, %s637_s5  ;;  %p643_p2 = scmp.lt.s32.totalorder %s637_s5, %s637_s5 }
   0xa   :  { %599 = vmatprep.mubr.msk.f32.mxu1 %vm660_vm0, %v659_v2  ;;  %592 = vmatprep.mubr.msk.f32.mxu0 %vm660_vm0, %v659_v2 }
   0xb   :  { %596 = vmatpush3.msk.msra.mxu1 %vm181_vm2, %v546_v41  ;;  %589 = vmatpush3.msk.msra.mxu0 %vm181_vm2, %v16_v43  ;;  %p644_p3 = por %p643_p2, %p642_p1 }
   0xc   :  { %597 = vmatprep.subr.mxu1 %v659_v2  ;;  %590 = vmatprep.subr.mxu0 %v659_v2 }
   0xd   :  { %598 = vmatpush3.msra.mxu1 %v545_v42  ;;  %591 = vmatpush3.msra.mxu0 %v15_v44  ;;  %p645_p4 = pnand %p644_p3, %p638_p0 }
   0xe   :  { %609 = vmatprep.subr.mxu1 %v659_v2  ;;  %602 = vmatprep.subr.mxu0 %v659_v2 }
  0xc9   :  { %v159_v9 = vpop.f32.mrf.mxu1  ;;  %v83_v10 = vpop.f32.mrf.mxu0 }
  0xca   :  { %v164_v11 = vadd.f32 %v163_v7, %v83_v10  ;;  %v345_v12 = vadd.f32 %v551_v8, %v83_v10  ;;  %v430_v13 = vadd.f32 %v551_v8, %v159_v9  ;;  %v255_v14 = vadd.f32 %v163_v7, %v159_v9 }
  0xcb   :  { %v587_v15 = vpop.f32.mrf.mxu1  ;;  %v580_v16 = vpop.f32.mrf.mxu0 }
  0xcc   :  { %v431_v17 = vsel %vm165_vm1, %v430_v13, -inf  ;;  %v256_v18 = vsel %vm165_vm1, %v255_v14, -inf  ;;  %v346_v19 = vsel %vm165_vm1, %v345_v12, -inf  ;;  %v166_v20 = vsel %vm165_vm1, %v164_v11, -inf }
  0xcd   :  { %432 = vmax.xlane.f32.xlu1 %v431_v17  ;;  %257 = vmax.xlane.f32.xlu0 %v256_v18 }
  0xd1   :  { %347 = vmax.xlane.f32.xlu1 %v346_v19  ;;  %167 = vmax.xlane.f32.xlu0 %v166_v20 }
 0x156   :  { %v433_v21 = vpop.xlane.xlu1 %432  ;;  %v258_v22 = vpop.xlane.xlu0 %257 }
 0x157   :  { %v434_v23 = vsub.f32 %v430_v13, %v433_v21  ;;  %v259_v24 = vsub.f32 %v255_v14, %v258_v22 }
 0x159   :  { %v260_v25 = vmul.f32 1.442695, %v259_v24  ;;  %v435_v26 = vmul.f32 1.442695, %v434_v23 }
 0x15a   :  { %v348_v27 = vpop.xlane.xlu1 %347  ;;  %v168_v28 = vpop.xlane.xlu0 %167 }
 0x15b   :  { %v349_v29 = vsub.f32 %v345_v12, %v348_v27  ;;  %v169_v30 = vsub.f32 %v164_v11, %v168_v28  ;;  %621 = vpow2.f32 %v260_v25 }
 0x15c   :  { %623 = vpow2.f32 %v435_v26 }
 0x15d   :  { %v170_v31 = vmul.f32 1.442695, %v169_v30  ;;  %v350_v32 = vmul.f32 1.442695, %v349_v29 }
 0x15f   :  { %625 = vpow2.f32 %v170_v31 }
 0x160   :  { %627 = vpow2.f32 %v350_v32 }
 0x168   :  { %v622_v33 = vpop.eup %621 }
 0x169   :  { %v262_v34 = vsel %vm165_vm1, %v622_v33, 0.0  ;;  %v624_v35 = vpop.eup %623 }
 0x16a   :  { %263 = vadd.xlane.f32.xlu0 %v262_v34  ;;  %v437_v37 = vsel %vm165_vm1, %v624_v35, 0.0 }
 0x16c   :  { %v626_v36 = vpop.eup %625 }
 0x16d   :  { %v172_v38 = vsel %vm165_vm1, %v626_v36, 0.0  ;;  %v628_v39 = vpop.eup %627 }
 0x16e   :  { %438 = vadd.xlane.f32.xlu0 %v437_v37  ;;  %173 = vadd.xlane.f32.xlu1 %v172_v38  ;;  %v352_v40 = vsel %vm165_vm1, %v628_v39, 0.0 }
 0x172   :  { %353 = vadd.xlane.f32.xlu1 %v352_v40 }
 0x1f3   :  { %v264_v45 = vpop.xlane.xlu0 %263 }
 0x1f4   :  { %629 = vrcp.f32 %v264_v45 }
 0x1f7   :  { %v174_v46 = vpop.xlane.xlu1 %173  ;;  %v439_v47 = vpop.xlane.xlu0 %438 }
 0x1f8   :  { %631 = vrcp.f32 %v174_v46 }
 0x1f9   :  { %633 = vrcp.f32 %v439_v47 }
 0x1fb   :  { %v354_v48 = vpop.xlane.xlu1 %353 }
 0x1fc   :  { %635 = vrcp.f32 %v354_v48 }
 0x201   :  { %v630_v49 = vpop.eup %629 }
 0x202   :  { %v266_v50 = vmul.f32 %v630_v49, %v622_v33 }
 0x204   :  { %600 = vmatmul.mubr.msk.f32.vlgmr.msra.gmra.mxu1 %vm177_vm3, %v266_v50 }
 0x205   :  { %v632_v51 = vpop.eup %631  ;;  %610 = vmatpush3.msk.msra.mxu1 %vm181_vm2, %v546_v41  ;;  %613 = vmatprep.mubr.msk.f32.mxu1 %vm660_vm0, %v659_v2 }
 0x206   :  { %v634_v52 = vpop.eup %633  ;;  %611 = vmatprep.subr.mxu1 %v659_v2  ;;  %v176_v53 = vmul.f32 %v632_v51, %v626_v36 }
 0x207   :  { %612 = vmatpush3.msra.mxu1 %v545_v42  ;;  %v441_v54 = vmul.f32 %v634_v52, %v624_v35 }
 0x208   :  { %593 = vmatmul.mubr.msk.f32.vlgmr.msra.gmra.mxu0 %vm177_vm3, %v176_v53 }
 0x209   :  { %v636_v55 = vpop.eup %635  ;;  %603 = vmatpush3.msk.msra.mxu0 %vm181_vm2, %v16_v43  ;;  %614 = vmatmul.mubr.msk.f32.vlgmr.msra.gmra.mxu1 %vm177_vm3, %v441_v54 }
 0x20a   :  { %604 = vmatprep.subr.mxu0 %v659_v2  ;;  %606 = vmatprep.mubr.msk.f32.mxu0 %vm660_vm0, %v659_v2  ;;  %v356_v56 = vmul.f32 %v636_v55, %v628_v39 }
 0x20b   :  { %605 = vmatpush3.msra.mxu0 %v15_v44 }
 0x20c   :  { %607 = vmatmul.mubr.msk.f32.vlgmr.msra.gmra.mxu0 %vm177_vm3, %v356_v56 }
 0x2c4   :  { %v339_v57 = vpop.f32.mrf.mxu1 }
 0x2c5   :  { %v516_v59 = vrot.slane %v339_v57, 4 }
 0x2c6   :  { %v601_v58 = vpop.f32.mrf.mxu1 }
 0x2c8   :  { %v251_v60 = vpop.f32.mrf.mxu0 }
 0x2c9   :  { %v522_v61 = vsel %vm521_vm4, %v251_v60, %v516_v59  ;;  %v511_v62 = vpop.f32.mrf.mxu1 }
 0x2ca   :  { %524 = vst [vmem:[#allocation2] sm:$0xff] %v522_v61  ;;  %v594_v63 = vpop.f32.mrf.mxu0  ;;  %v519_v0 = vrot.slane %v511_v62, 4 }
 0x2cb   :  { %v615_v1 = vpop.f32.mrf.mxu1 }
 0x2cc   :  { %v426_v3 = vpop.f32.mrf.mxu0 }
 0x2cd   :  { %v523_v2 = vsel %vm521_vm4, %v426_v3, %v519_v0 }
 0x2ce   :  { %525 = vst [vmem:[#allocation2 + $0x8] sm:$0xff] %v523_v2  ;;  %v608_v4 = vpop.f32.mrf.mxu0 }
 0x2cf   :  { %648 = shalt.err (!%p645_p4)
}
 0x2d0   :  { %s662_s6 = smov 128   ;;  %s663_s7 = smov 8  }
 0x2d1   :  { %537 = dma.vmem_to_hbm [thread:$0]  %s532_s4, 256, %s760_s2, [#allocation3], %s662_s6, %s662_s6, %s663_s7  }
 0x2d2   :  { %657 = dma.done.wait [#allocation3], 256  }
 0x2d3   :  { %658 = vsyncadd [#allocation3], 4294967040 }
 0x2d4   :  { %541 = vsyncpa [#allocation3], 1 }

</bundles_post_ra>
